<compile_context>
chip_gen: v7x
topology: tpu7x:2x2x1
jax: 0.10.0
libtpu: 0.0.40
codegen_flags: <defaults>
</compile_context>

<pallas_src>
import jax
import jax.numpy as jnp
from jax.experimental import pallas as pl
from jax.experimental.pallas import tpu as pltpu


def _scse_kernel(x_ref, c_att_ref, ws_ref, bs_ref, o_ref):
    # x_ref:     (1, C, HW_TILE) block of the input (input dtype)
    # c_att_ref: (1, C, 1)       precomputed channel attention (already x.dtype)
    # ws_ref:    (1, C)          sSE 1x1-conv weight row (x.dtype)
    # bs_ref:    (1,)            sSE bias scalar in SMEM (f32)
    x = x_ref[0]                                            # (C, HW_TILE)

    # ---- spatial SE: (1, C) @ (C, HW_TILE) -> (1, HW_TILE) on the MXU,
    #      native-dtype operands, f32 accumulation (no full-tile upcast) ----
    s = jnp.dot(ws_ref[...], x, preferred_element_type=jnp.float32) + bs_ref[0]
    s_att = jax.nn.sigmoid(s).astype(x.dtype)               # (1, HW_TILE) per-lane scale

    # ---- channel SE: per-sublane scale, broadcast across lanes ----
    c_att = c_att_ref[0]                                    # (C, 1), x.dtype

    # Single combine in the input dtype (bf16 VALU on v6e/v7x; f32 stays f32).
    o_ref[0] = x * (c_att + s_att)


def _budgets():
    """Generation-aware (max_tile_bytes, vmem_limit_bytes)."""
    vmem_cap = 64 * 1024 * 1024  # conservative default if query fails
    try:
        vmem_cap = getattr(pltpu.get_tpu_info(), "vmem_capacity_bytes", vmem_cap)
    except Exception:
        pass
    if vmem_cap <= 64 * 1024 * 1024:
        # v7x: 64 MiB physical VMEM -> ~4 MiB tiles, 48 MiB pipelined budget.
        return 4 * 1024 * 1024, 48 * 1024 * 1024
    # v5e / v6e: 128 MiB physical VMEM -> ~8 MiB tiles, 96 MiB budget.
    return 8 * 1024 * 1024, 96 * 1024 * 1024


def _pick_hw_tile(hw_pad, c, itemsize, max_tile_bytes, batch):
    """Largest lane-dense (multiple-of-128) divisor of hw_pad under the VMEM
    budget, preferring an even total number of parallel grid steps (v7x: 2 TCs,
    and >=2 steps when batch == 1)."""
    divisors = [d for d in range(128, hw_pad + 1, 128) if hw_pad % d == 0]
    fitting = [d for d in divisors if c * d * itemsize <= max_tile_bytes]
    if not fitting:
        fitting = [divisors[0]]  # smallest lane-dense divisor
    even = [d for d in fitting if (batch * (hw_pad // d)) % 2 == 0]
    return max(even) if even else max(fitting)


def scse_forward(x_nchw, params):
    """x_nchw: (N, C, H, W).  Returns (N, C, H, W)."""
    w1, b1, w2, b2, ws, bs = params
    N, C, H, W = x_nchw.shape
    HW = H * W

    # Free reshape (HW is contiguous in NCHW); no NCHW<->NHWC transposes.
    x = x_nchw.reshape(N, C, HW)

    # ---- cSE attention on the tiny pooled (N, C) tensor (hoisted out of the
    #      tiled kernel body).  f32 accumulation without materializing f32(x). ----
    pooled = jnp.mean(x, axis=-1, dtype=jnp.float32)                 # (N, C)
    h = jnp.maximum(pooled @ w1 + b1, 0.0)                           # (N, Cr)
    c_att = jax.nn.sigmoid(h @ w2 + b2)[..., None].astype(x.dtype)   # (N, C, 1)

    ws_row = ws.reshape(1, C).astype(x.dtype)                        # (1, C)
    bs_vec = bs.reshape(1).astype(jnp.float32)                       # (1,) -> SMEM

    # Pad HW to a lane-dense multiple of 128; padded lanes are sliced off after
    # the kernel (they only ever see their own padded output positions).
    HW_pad = ((HW + 127) // 128) * 128
    if HW_pad != HW:
        x = jnp.pad(x, ((0, 0), (0, 0), (0, HW_pad - HW)))

    max_tile_bytes, vmem_limit = _budgets()
    hw_tile = _pick_hw_tile(HW_pad, C, x.dtype.itemsize, max_tile_bytes, N)
    n_tiles = HW_pad // hw_tile

    out = pl.pallas_call(
        _scse_kernel,
        out_shape=jax.ShapeDtypeStruct((N, C, HW_pad), x.dtype),
        grid_spec=pltpu.PrefetchScalarGridSpec(
            num_scalar_prefetch=0,
            grid=(N, n_tiles),
            in_specs=[
                pl.BlockSpec((1, C, hw_tile), lambda b, t: (b, 0, t)),   # x tile
                pl.BlockSpec((1, C, 1), lambda b, t: (b, 0, 0)),         # c_att
                pl.BlockSpec((1, C), lambda b, t: (0, 0)),               # ws row
                pl.BlockSpec(memory_space=pltpu.MemorySpace.SMEM),       # bs scalar
            ],
            out_specs=pl.BlockSpec((1, C, hw_tile), lambda b, t: (b, 0, t)),
        ),
        compiler_params=pltpu.CompilerParams(
            dimension_semantics=("parallel", "parallel"),
            vmem_limit_bytes=vmem_limit,
        ),
    )(x, c_att, ws_row, bs_vec)

    if HW_pad != HW:
        out = out[..., :HW]
    return out.reshape(N, C, H, W)


def scse_reference(x_nchw, params):
    """Pure-JAX reference mirroring the PyTorch forward."""
    w1, b1, w2, b2, ws, bs = params
    xf = x_nchw.astype(jnp.float32)
    # cSE
    pooled = jnp.mean(xf, axis=(2, 3))                        # (N, C)
    h = jnp.maximum(pooled @ w1 + b1, 0.0)                    # (N, Cr)
    c_att = jax.nn.sigmoid(h @ w2 + b2)[:, :, None, None]     # (N, C, 1, 1)
    # sSE
    s = jnp.einsum("nchw,co->nohw", xf, ws) + bs.reshape(1, 1, 1, 1)
    s_att = jax.nn.sigmoid(s)                                 # (N, 1, H, W)
    return (xf * c_att + xf * s_att).astype(x_nchw.dtype)


def make_params(in_channels, reduction, key):
    """Deterministic synthetic weights (conv 1x1 kernels stored as matmul mats)."""
    Cr = in_channels // reduction
    assert Cr >= 1, "in_channels must be >= reduction"
    k1, k2, k3, k4, k5, k6 = jax.random.split(key, 6)
    w1 = jax.random.normal(k1, (in_channels, Cr), jnp.float32) * 0.2
    b1 = jax.random.normal(k2, (1, Cr), jnp.float32) * 0.1
    w2 = jax.random.normal(k3, (Cr, in_channels), jnp.float32) * 0.2
    b2 = jax.random.normal(k4, (1, in_channels), jnp.float32) * 0.1
    ws = jax.random.normal(k5, (in_channels, 1), jnp.float32) * 0.2
    bs = jax.random.normal(k6, (1, 1), jnp.float32) * 0.1
    return (w1, b1, w2, b2, ws, bs)


if __name__ == "__main__":
    # Small shapes consistent with the module: reduction=16 needs C >= 16;
    # 16x16 spatial gives HW=256 (lane-dense multiple of 128).
    N, C, H, W = 2, 32, 16, 16
    reduction = 16

    key = jax.random.PRNGKey(0)
    kx, kp = jax.random.split(key)
    x = jax.random.normal(kx, (N, C, H, W), jnp.float32)
    params = make_params(C, reduction, kp)

    out = jax.block_until_ready(scse_forward(x, params))
    ref = jax.block_until_ready(scse_reference(x, params))

    assert out.shape == (N, C, H, W)
    assert jnp.allclose(out, ref, atol=1e-5, rtol=1e-5), "mismatch vs reference"
    print("KERNEL_OK")
</pallas_src>

<mosaic_0001>
module attributes {stable_mosaic.version = 11 : i64} {
  func.func @_scse_kernel(%arg0: i32, %arg1: i32, %arg2: memref<1x32x256xf32, #tpu.memory_space<vmem>>, %arg3: memref<1x32x1xf32, #tpu.memory_space<vmem>>, %arg4: memref<1x32xf32, #tpu.memory_space<vmem>>, %arg5: memref<1xf32, #tpu.memory_space<smem>>, %arg6: memref<1x32x256xf32, #tpu.memory_space<vmem>>) attributes {dimension_semantics = [#tpu.dimension_semantics<parallel>, #tpu.dimension_semantics<parallel>], iteration_bounds = array<i64: 2, 1>, scalar_prefetch = 0 : i64, scratch_operands = 0 : i64, tpu.core_type = #tpu.core_type<tc>, window_params = [{transform_indices = @transform_0, window_bounds = array<i64: 1, 32, 256>}, {transform_indices = @transform_1, window_bounds = array<i64: 1, 32, 1>}, {pipeline_mode = #tpu.pipeline_mode<synchronous>, transform_indices = @transform_2, window_bounds = array<i64: 1, 32>}, {transform_indices = @transform_3, window_bounds = array<i64: 1>}, {transform_indices = @transform_4, window_bounds = array<i64: 1, 32, 256>}]} {
    %c0 = arith.constant 0 : index
    %c0_0 = arith.constant 0 : index
    %c0_1 = arith.constant 0 : index
    %0 = vector.load %arg2[%c0, %c0_0, %c0_1] : memref<1x32x256xf32, #tpu.memory_space<vmem>>, vector<1x32x256xf32>
    %1 = vector.shape_cast %0 : vector<1x32x256xf32> to vector<32x256xf32>
    %c0_2 = arith.constant 0 : index
    %c0_3 = arith.constant 0 : index
    %2 = vector.load %arg4[%c0_2, %c0_3] : memref<1x32xf32, #tpu.memory_space<vmem>>, vector<1x32xf32>
    %cst = arith.constant dense<0.000000e+00> : vector<1x256xf32>
    %3 = tpu.matmul %2, %1, %cst {dimension_numbers = #tpu.dot_dimension_numbers<[1], [0], [0], [1], [0, 0, 1, 1], [], []>} : vector<1x32xf32>, vector<32x256xf32>, vector<1x256xf32> -> vector<1x256xf32>
    %c0_4 = arith.constant 0 : index
    %4 = memref.load %arg5[%c0_4] : memref<1xf32, #tpu.memory_space<smem>>
    %5 = vector.broadcast %4 : f32 to vector<1x256xf32>
    %6 = arith.addf %3, %5 : vector<1x256xf32>
    %7 = arith.negf %6 : vector<1x256xf32>
    %8 = math.exp %7 : vector<1x256xf32>
    %cst_5 = arith.constant 1.000000e+00 : f32
    %9 = vector.broadcast %cst_5 : f32 to vector<1x256xf32>
    %10 = arith.addf %9, %8 : vector<1x256xf32>
    %11 = arith.divf %9, %10 : vector<1x256xf32>
    %c0_6 = arith.constant 0 : index
    %c0_7 = arith.constant 0 : index
    %c0_8 = arith.constant 0 : index
    %12 = vector.load %arg3[%c0_6, %c0_7, %c0_8] : memref<1x32x1xf32, #tpu.memory_space<vmem>>, vector<1x32x1xf32>
    %13 = vector.shape_cast %12 : vector<1x32x1xf32> to vector<32x1xf32>
    %14 = vector.broadcast %13 : vector<32x1xf32> to vector<32x256xf32>
    %15 = vector.broadcast %11 : vector<1x256xf32> to vector<32x256xf32>
    %16 = arith.addf %14, %15 : vector<32x256xf32>
    %17 = arith.mulf %1, %16 : vector<32x256xf32>
    %c0_9 = arith.constant 0 : index
    %c0_10 = arith.constant 0 : index
    %c0_11 = arith.constant 0 : index
    %18 = vector.load %arg6[%c0_9, %c0_10, %c0_11] : memref<1x32x256xf32, #tpu.memory_space<vmem>>, vector<1x32x256xf32>
    %19 = vector.shape_cast %18 : vector<1x32x256xf32> to vector<32x256xf32>
    %20 = vector.shape_cast %17 : vector<32x256xf32> to vector<1x32x256xf32>
    tpu.vector_store %arg6[%c0_9, %c0_10, %c0_11], %20 {strides = array<i32>} : memref<1x32x256xf32, #tpu.memory_space<vmem>>, vector<1x32x256xf32>,
    return
  }
  func.func @transform_0(%arg0: i32, %arg1: i32) -> (i32, i32, i32) {
    %c0_i32 = arith.constant 0 : i32
    %c0_i32_0 = arith.constant 0 : i32
    return %arg0, %c0_i32, %arg1 : i32, i32, i32
  }
  func.func @transform_1(%arg0: i32, %arg1: i32) -> (i32, i32, i32) {
    %c0_i32 = arith.constant 0 : i32
    %c0_i32_0 = arith.constant 0 : i32
    %c0_i32_1 = arith.constant 0 : i32
    return %arg0, %c0_i32, %c0_i32_0 : i32, i32, i32
  }
  func.func @transform_2(%arg0: i32, %arg1: i32) -> (i32, i32) {
    %c0_i32 = arith.constant 0 : i32
    %c0_i32_0 = arith.constant 0 : i32
    %c0_i32_1 = arith.constant 0 : i32
    return %c0_i32, %c0_i32_0 : i32, i32
  }
  func.func @transform_3(%arg0: i32, %arg1: i32) -> i32 {
    %c0_i32 = arith.constant 0 : i32
    %c0_i32_0 = arith.constant 0 : i32
    return %c0_i32 : i32
  }
  func.func @transform_4(%arg0: i32, %arg1: i32) -> (i32, i32, i32) {
    %c0_i32 = arith.constant 0 : i32
    %c0_i32_0 = arith.constant 0 : i32
    return %arg0, %c0_i32, %arg1 : i32, i32, i32
  }
}

</mosaic_0001>

<bundles_post_ra>
// kernel: tpu_custom_call.1
= control target key start
LH: loop header
LB: loop body
LE: loop exit
PB: predicated region body
PF: predicated region fallthrough
CT: control target
= control target key end

     0   :  { %s996_s0 = inlined_call_operand.hbm [shape: f32[2,32,256], index: 0, kind: input, shape index: {}]   ;;  %s997_s1 = inlined_call_operand.vmem [shape: f32[2,32,1], index: 1, kind: input, shape index: {}]   ;;  %s998_s2 = inlined_call_operand.vmem [shape: f32[1,32], index: 2, kind: input, shape index: {}]   ;;  %s999_s3 = inlined_call_operand.<no memory space> [shape: f32[1], index: 3, kind: input, shape index: {}]   ;;  %s1000_s4 = inlined_call_operand.hbm [shape: f32[2,32,256], index: 4, kind: output, shape index: {}]  }
   0x1   :  { %9 = sst [smem:[#allocation2]] %s999_s3 }
   0x2   :  { %10 = vsyncpa [#allocation4], 0 }
   0x3   :  { %12 = vsyncpa [#allocation4 + $0x1], 0 }
   0x4   :  { %13 = vsyncpa [#allocation5], 0 }
   0x5   :  { %15 = vsyncpa [#allocation5 + $0x1], 0  ;;  %s785_s17 = smov 0   ;;  %s787_s18 = smov 0  }
   0x6   :  { %s789_s19 = smov 0   ;;  %s791_s20 = smov 0  }
   0x7   :  { %s793_s21 = smov 0   ;;  %s795_s22 = smov 0  }
   0x8 LB: > { %s526_s3 = sadd.s32 4294967295, %s747_s22   ;;  %s527_s23 = sadd.s32 4294967294, %s747_s22   ;;  %s747_s22 = sphi %s795_s22, %s21_s22   ;;  %s743_s21 = sphi %s793_s21, %s1015_s21   ;;  %s739_s20 = sphi %s791_s20, %s1014_s20   ;;  %s735_s19 = sphi %s789_s19, %s1013_s19   ;;  %s731_s18 = sphi %s787_s18, %s1012_s18   ;;  %s727_s17 = sphi %s785_s17, %s1011_s17  }
   0x9   : > { %s33_s24 = sadd.s32 1, %s743_s21  ;;  %s42_s25 = sadd.s32 1, %s735_s19 }
   0xa   : > { %p35_p0 = scmp.ge.s32.totalorder %s33_s24, 2  ;;  %p49_p1 = scmp.ne.s32.totalorder %s735_s19, %s731_s18 }
   0xb   : > { %p50_p2 = scmp.eq.s32.totalorder %s747_s22, 0  ;;  %p55_p3 = scmp.ne.s32.totalorder %s731_s18, %s727_s17 }
   0xc   : > { %s1017_s24 = smov (%p35_p0, %s33_s24), 0  ;;  %p56_p5 = scmp.eq.s32.totalorder %s526_s3, 0 }
   0xd   : > { %p826_p4 = por %p50_p2, %p49_p1  ;;  %s37_s27 = ssub.s32 %s743_s21, %s1017_s24 }
   0xe   : > { %p149_p6 = scmp.eq.s32.totalorder %s526_s3, 1  ;;  %p40_p7 = scmp.eq.s32.totalorder %s37_s27, 0 }
   0xf   : > { %p832_p8 = por %p56_p5, %p55_p3  ;;  %p155_p10 = scmp.eq.s32.totalorder %s527_s23, 1 }
  0x10   : > { %p836_p9 = por %p149_p6, %p49_p1  ;;  %p569_p13 = scmp.lt.s32.totalorder %s747_s22, 2 }
  0x11   : > { %s841_s30 = scalar_select %p40_p7, %s735_s19, %s42_s25  }
  0x12   : > { %s1004_s29 = scalar_select %p836_p9, 1, 0 }
  0x13   : > { %p843_p11 = por %p155_p10, %p55_p3  ;;  %s181_s6 = sand.u32 1, %s735_s19  }
  0x14   : > { %s530_s7 = sshll.u32 %s181_s6, 6  ;;  %s546_s8 = sshll.u32 %s743_s21, 10 }
  0x15   : > { %s1005_s5 = scalar_select %p843_p11, 1, 0 }
  0x16   : > { %s854_s11 = scalar_lea.hbm %s996_s0, %s546_s8  ;;  %s185_s12 = scalar_lea.vmem [#allocation3], %s530_s7 }
  0x17   : > { %s194_s13 = sshll.u32 %s185_s12, 4  ;;  %p860_p0 = pnand %p569_p13, %p826_p4  ;;  %s856_s13 = int_to_ptr.vmem [resolvable:$true] %s194_s13 }
  0x18   : > { %s865_s15 = scalar_lea.sflag [#allocation4], %s181_s6  ;;  %s635_s16 = scalar_lea.hbm %s854_s11, 1024 }
  0x19   : > { %p636_p2 = scmp.ne.s32.totalorder %s854_s11, %s635_s16  ;;  %p637_p3 = pneg %p860_p0 }
  0x1a   : > { %s640_s25 = scalar_lea.hbm %s996_s0, 2048  ;;  %p641_p4 = scmp.lt.u32.totalorder %s854_s11, %s996_s0 }
  0x1b   : > { %p638_p5 = pnand %p637_p3, %p636_p2  ;;  %p642_p7 = scmp.lt.u32.totalorder %s640_s25, %s635_s16 }
  0x1c   : > { %p644_p13 = scmp.lt.u32.totalorder %s635_s16, %s854_s11 }
  0x1d   : > { %p639_p6 = pneg %p638_p5  ;;  %p643_p10 = por %p642_p7, %p641_p4 }
  0x1f   : > { %p645_p12 = por %p644_p13, %p643_p10 }
  0x21   : > { %p646_p1 = pnand %p645_p12, %p639_p6 }
  0x23   : > { %649 = shalt.err (!%p646_p1)
}
  0x24   : > { %s650_s6 = scalar_lea.vmem %s856_s13, 1024  ;;  %s749_s7 = smov [#allocation3]  }
  0x25   : > { %p651_p2 = scmp.ne.s32.totalorder %s856_s13, %s650_s6  ;;  %s655_s8 = sshll.u32 %s749_s7, 4  ;;  %s656_s8 = int_to_ptr.vmem [resolvable:$false] %s655_s8 }
  0x26   : > { %s657_s9 = scalar_lea.vmem %s656_s8, 2048  ;;  %p658_p9 = scmp.lt.s32.totalorder %s856_s13, %s656_s8 }
  0x27   : > { %p653_p5 = pnand %p651_p2, %p637_p3  ;;  %p659_p4 = scmp.lt.s32.totalorder %s657_s9, %s650_s6 }
  0x29   : > { %p654_p11 = pneg %p653_p5  ;;  %p660_p7 = por %p659_p4, %p658_p9 }
  0x2b   : > { %p661_p10 = pnand %p660_p7, %p654_p11 }
  0x2d   : > { %664 = shalt.err (!%p661_p10)
}
  0x2e   : > { %s750_s10 = smov 256   ;;  %s751_s12 = smov 16  }
  0x2f   : > { %564 = dma.hbm_to_vmem [thread:$0]  (!%p860_p0), %s854_s11, 1024, %s856_s13, %s865_s15, %s750_s10, %s750_s10, %s751_s12  }
  0x30   : > { %p210_p12 = scmp.lt.s32.totalorder %s747_s22, 3  ;;  %p1007_p1 = scmp.ge.s32.totalorder %s747_s22, 1 }
  0x32   : > { %p211_p3 = pnand %p1007_p1, %p210_p12 }
  0x33   : > { %s897_s16 = sand.u32 (!%p211_p3), 1, %s731_s18  }
  0x34   : > { %214 = sbr.rel (%p211_p3) target bundleno = 336 (0x150), region = 36  ;;  %s534_s3 = sshll.u32 (!%p211_p3), %s897_s16, 6 }
  0x35   : > { %s217_s23 = scalar_lea.sflag (!%p211_p3), [#allocation4], %s897_s16  ;;  %s220_s25 = scalar_lea.vmem (!%p211_p3), [#allocation3], %s534_s3 }
  0x3b   : > { %718 = dma.done.wait (%p832_p8), %s217_s23, 1024  }
  0x3c   : > { %720 = vsyncadd (%p832_p8), %s217_s23, 4294966272  ;;  %p251_p9 = scmp.lt.s32.totalorder %s739_s20, 1  ;;  %v752_v0 = vmov 0.0   ;;  %v753_v1 = vmov 0   ;;  %v909_v2 = vld [vmem:[%s220_s25 + $0x8] sm:$0xff]  ;;  %v911_v3 = vld [vmem:[%s220_s25 + $0x18] sm:$0xff]  ;;  %v379_v30 = vlaneseq }
  0x3d   : > { %336 = vmatprep.mubr.f32.mxu0 %v752_v0  ;;  %626 = vset.pattern.permute.xlu1 %v753_v1  ;;  %v913_v4 = vld [vmem:[%s220_s25] sm:$0xff]  ;;  %v549_v5 = vpack.c.bf16 %v911_v3, %v909_v2  ;;  %v920_v6 = vld [vmem:[%s220_s25 + $0x10] sm:$0xff]  ;;  %v922_v7 = vld [vmem:[%s220_s25 + $0x28] sm:$0xff]  ;;  %vm268_vm0 = vcmask 261120   ;;  %s266_s6 = sld [smem:[#allocation2]]  ;;  %s548_s7 = sshll.u32 %s739_s20, 10 }
  0x3e   : > { %625 = vset.pattern.permute.xlu0 %v753_v1  ;;  %s252_s11 = scalar_select %p251_p9, %s739_s20, 1  ;;  %v924_v8 = vld [vmem:[%s220_s25 + $0x38] sm:$0xff]  ;;  %v551_v9 = vpack.c.bf16 %v920_v6, %v913_v4  ;;  %v261_v11 = vld [vmem:[%s220_s25 + $0x20] sm:$0xff]  ;;  %v263_v12 = vld [vmem:[%s220_s25 + $0x30] sm:$0xff]  ;;  %v380_v31 = vshrl.u32 %v379_v30, 7 }
  0x3f   : > { %v553_v10 = vpack.c.bf16 %v924_v8, %v922_v7  ;;  %550 = vmatprep.subr.bf16.mxu0 %v549_v5  ;;  %v555_v15 = vpack.c.bf16 %v263_v12, %v261_v11  ;;  %v265_v18 = vld [vmem:[%s998_s2] sm:$0x1]  ;;  %s249_s8 = scalar_lea.vmem [#allocation6], %s534_s3  ;;  %s941_s12 = scalar_lea.hbm %s1000_s4, %s548_s7 }
  0x40   : > { %s547_s13 = sshll.u32 %s252_s11, 5  ;;  %552 = vmatpush1.bf16.msra.mxu0 %v551_v9  ;;  %v381_v34 = vsub.s32 0, %v380_v31  ;;  %s427_s9 = sshll.u32 %s249_s8, 4  ;;  %s943_s9 = int_to_ptr.vmem [resolvable:$true] %s427_s9 }
  0x41   : > { %s255_s28 = scalar_lea.vmem %s997_s1, %s547_s13  ;;  %554 = vmatprep.subr.bf16.mxu0 %v553_v10  ;;  %s412_s3 = scalar_lea.sflag [#allocation5], %s897_s16 }
  0x42   : > { %v357_v13 = vld [vmem:[%s255_s28 + $0x10] sm:$0xff]  ;;  %v355_v14 = vld [vmem:[%s255_s28] sm:$0xff]  ;;  %v358_v16 = vld [vmem:[%s255_s28 + $0x18] sm:$0xff]  ;;  %s665_s23 = scalar_lea.vmem %s943_s9, 1024  ;;  %p1008_p11 = scmp.ne.s32.totalorder %s1004_s29, 0 }
  0x43   : > { %371 = vperm.xlu1 %626, %v357_v13   ;;  %361 = vperm.xlu0 %625, %v355_v14   ;;  %v356_v17 = vld [vmem:[%s255_s28 + $0x8] sm:$0xff]  ;;  %v267_v19 = vstv %s266_s6  ;;  %p666_p8 = scmp.ne.s32.totalorder %s943_s9, %s665_s23  ;;  %s754_s25 = smov [#allocation6]  }
  0x44   : > { %556 = vmatpush1.bf16.msra.mxu0 %v555_v15  ;;  %s669_s11 = sshll.u32 %s754_s25, 4  ;;  %s670_s11 = int_to_ptr.vmem [resolvable:$false] %s669_s11 }
  0x45   : > { %p667_p0 = pnand %p666_p8, %p1008_p11  ;;  %s671_s13 = scalar_lea.vmem %s670_s11, 2048 }
  0x46   : > { %p672_p13 = scmp.lt.s32.totalorder %s943_s9, %s670_s11  ;;  %p673_p2 = scmp.lt.s32.totalorder %s671_s13, %s665_s23 }
  0x47   : > { %376 = vperm.xlu1 %626, %v358_v16   ;;  %366 = vperm.xlu0 %625, %v356_v17   ;;  %p668_p6 = pneg %p667_p0 }
  0x48   : > { %538 = vmatmul.mubr.msk.f32.vlgmr.msra.gmra.mrb[0].mxu0 %vm268_vm0, %v265_v18  ;;  %p674_p5 = por %p673_p2, %p672_p13 }
  0x4a   : > { %p675_p4 = pnand %p674_p5, %p668_p6 }
  0xc2   : > { %v372_v32 = vpop.permute.xlu1 %371  ;;  %v362_v33 = vpop.permute.xlu0 %361 }
  0xc6   : > { %v377_v39 = vpop.permute.xlu1 %376  ;;  %v367_v40 = vpop.permute.xlu0 %366 }
 0x11b   : > { %v338_v20 = vpop.f32.mrb[0].mxu0 }
 0x11c   : > { %v339_v21 = vadd.f32 %v338_v20, %v267_v19  ;;  %v340_v22 = vpop.f32.mrb[1].mxu0 }
 0x11d   : > { %v341_v23 = vadd.f32 %v340_v22, %v267_v19 }
 0x11e   : > { %v539_v24 = vmul.f32 -1.442695, %v339_v21 }
 0x11f   : > { %v540_v25 = vmul.f32 -1.442695, %v341_v23 }
 0x120   : > { %627 = vpow2.f32 %v539_v24 }
 0x121   : > { %629 = vpow2.f32 %v540_v25 }
 0x12a   : > { %v628_v26 = vpop.eup %627 }
 0x12b   : > { %v630_v27 = vpop.eup %629  ;;  %v349_v28 = vadd.f32 1.0, %v628_v26 }
 0x12c   : > { %v350_v29 = vadd.f32 1.0, %v630_v27 }
 0x12d   : > { %631 = vrcp.f32 %v349_v28 }
 0x12e   : > { %633 = vrcp.f32 %v350_v29 }
 0x137   : > { %v632_v35 = vpop.eup %631 }
 0x138   : > { %v634_v36 = vpop.eup %633  ;;  %v382_v37 = vrot.slane %v632_v35, %v381_v34 }
 0x139   : > { %v386_v38 = vrot.slane %v634_v36, %v381_v34 }
 0x13a   : > { %v391_v41 = vadd.f32 %v382_v37, %v372_v32  ;;  %v387_v42 = vadd.f32 %v382_v37, %v362_v33  ;;  %v393_v43 = vadd.f32 %v382_v37, %v377_v39  ;;  %v389_v44 = vadd.f32 %v382_v37, %v367_v40 }
 0x13b   : > { %v392_v45 = vadd.f32 %v386_v38, %v372_v32  ;;  %v388_v46 = vadd.f32 %v386_v38, %v362_v33  ;;  %v394_v47 = vadd.f32 %v386_v38, %v377_v39  ;;  %v390_v48 = vadd.f32 %v386_v38, %v367_v40 }
 0x13c   : > { %v399_v49 = vmul.f32 %v391_v41, %v261_v11  ;;  %v395_v50 = vmul.f32 %v387_v42, %v913_v4  ;;  %v401_v51 = vmul.f32 %v393_v43, %v263_v12  ;;  %v397_v52 = vmul.f32 %v389_v44, %v920_v6 }
 0x13d   : > { %v400_v53 = vmul.f32 %v392_v45, %v922_v7  ;;  %v396_v54 = vmul.f32 %v388_v46, %v909_v2  ;;  %v402_v55 = vmul.f32 %v394_v47, %v924_v8  ;;  %v398_v56 = vmul.f32 %v390_v48, %v911_v3 }
 0x13e   : > { %407 = vst [vmem:[%s249_s8 + $0x20] sm:$0xff] %v399_v49  ;;  %403 = vst [vmem:[%s249_s8] sm:$0xff] %v395_v50 }
 0x13f   : > { %409 = vst [vmem:[%s249_s8 + $0x30] sm:$0xff] %v401_v51  ;;  %405 = vst [vmem:[%s249_s8 + $0x10] sm:$0xff] %v397_v52 }
 0x140   : > { %408 = vst [vmem:[%s249_s8 + $0x28] sm:$0xff] %v400_v53  ;;  %404 = vst [vmem:[%s249_s8 + $0x8] sm:$0xff] %v396_v54 }
 0x141   : > { %410 = vst [vmem:[%s249_s8 + $0x38] sm:$0xff] %v402_v55  ;;  %406 = vst [vmem:[%s249_s8 + $0x18] sm:$0xff] %v398_v56 }
 0x142   : > { %678 = shalt.err (!%p675_p4)
}
 0x143   : > { %s679_s14 = scalar_lea.hbm %s941_s12, 1024  ;;  %s683_s26 = scalar_lea.hbm %s1000_s4, 2048 }
 0x144   : > { %p680_p7 = scmp.ne.s32.totalorder %s941_s12, %s679_s14  ;;  %p684_p1 = scmp.lt.u32.totalorder %s941_s12, %s1000_s4 }
 0x145   : > { %p685_p3 = scmp.lt.u32.totalorder %s683_s26, %s679_s14  ;;  %p687_p8 = scmp.lt.u32.totalorder %s679_s14, %s941_s12 }
 0x146   : > { %p681_p10 = pnand %p680_p7, %p1008_p11 }
 0x147   : > { %p686_p9 = por %p685_p3, %p684_p1 }
 0x148   : > { %p682_p12 = pneg %p681_p10 }
 0x149   : > { %p688_p0 = por %p687_p8, %p686_p9 }
 0x14b   : > { %p689_p6 = pnand %p688_p0, %p682_p12 }
 0x14d   : > { %692 = shalt.err (!%p689_p6)
}
 0x14e   : > { %s755_s7 = smov 256   ;;  %s756_s8 = smov 16  }
 0x14f   : > { %559 = dma.vmem_to_hbm [thread:$0]  (%p1008_p11), %s943_s9, 1024, %s941_s12, %s412_s3, %s755_s7, %s755_s7, %s756_s8  }
 0x150 PF: > { %s442_s10 = sand.u32 1, %s727_s17   ;;  %p1009_p13 = scmp.ne.s32.totalorder %s1005_s5, 0 }
 0x151   : > { %p1010_p2 = scmp.ge.s32.totalorder %s747_s22, 2  ;;  %s443_s20 = scalar_lea.sflag [#allocation5], %s442_s10 }
 0x153   : > { %p566_p5 = pnand %p1010_p2, %p1009_p13 }
 0x155   : > { %722 = dma.done.wait (!%p566_p5), %s443_s20, 1024  }
 0x156   : > { %724 = vsyncadd (!%p566_p5), %s443_s20, 4294966272  ;;  %s21_s22 = sadd.s32 1, %s747_s22   ;;  %s1011_s17 = smov %s731_s18 }
 0x157   : > { %p18_p4 = scmp.ge.s32.totalorder %s21_s22, 4   ;;  %s1012_s18 = smov %s735_s19 }
 0x158   : > { %s1013_s19 = smov %s841_s30  ;;  %s1014_s20 = smov %s743_s21 }
 0x159   : > { %s1015_s21 = smov %s1017_s24  ;;  %20 = sbr.rel (!%p18_p4) target bundleno = 8 (0x8), region = 84 }
 0x160   :  { %448 = vsyncpa [#allocation4], 1 }
 0x161   :  { %450 = vsyncpa [#allocation4 + $0x1], 1 }
 0x162   :  { %451 = vsyncpa [#allocation5], 1 }
 0x163   :  { %453 = vsyncpa [#allocation5 + $0x1], 1 }

</bundles_post_ra>
